<compile_context>
chip_gen: v5e
topology: v5e:2x2
jax: 0.10.0
libtpu: 0.0.40
codegen_flags: <defaults>
</compile_context>

<pallas_src>
import jax
import jax.numpy as jnp
from jax import lax
from jax.experimental import pallas as pl
from jax.experimental.pallas import tpu as pltpu


def ae2_kernel(x_ref, w1_ref, b1_ref, w2_ref, b2_ref, yt_ref, ht_ref):
    """One batch tile, computed in transposed (feature-major) layout.

    x_ref : (tile_b, n_feature)    batch rows of the input tile
    w1_ref: (n_hidden, n_feature)  torch.nn.Linear layout (out, in)
    b1_ref: (n_hidden, 1)
    w2_ref: (n_output, n_hidden)
    b2_ref: (n_output, 1)
    yt_ref: (n_output, tile_b)     lane-dense output (batch on lanes)
    ht_ref: (n_hidden, tile_b)     lane-dense hidden activations
    """
    # hT = relu(W1 @ x^T + b1): contract the feature dims directly with
    # dot_general (no wrapper transpose). Result (n_hidden, tile_b) keeps the
    # big batch dim on lanes -> unmasked, full-width vector stores.
    ht = lax.dot_general(
        w1_ref[...], x_ref[...],
        dimension_numbers=(((1,), (1,)), ((), ())),
        preferred_element_type=jnp.float32,
    )
    ht = jnp.maximum(ht + b1_ref[...], 0.0)
    ht_ref[...] = ht.astype(ht_ref.dtype)

    # yT = W2 @ hT + b2 -> (n_output, tile_b). Computed from the f32 hidden
    # accumulator; bias add / ReLU stay in f32 regardless of compute_dtype.
    yt = lax.dot_general(
        w2_ref[...], ht,
        dimension_numbers=(((1,), (0,)), ((), ())),
        preferred_element_type=jnp.float32,
    )
    yt_ref[...] = (yt + b2_ref[...]).astype(yt_ref.dtype)


def ae2_forward(x, w1, b1, w2, b2, *,
                tile_b=8192,
                compute_dtype=None,
                hidden_dtype=None,
                output_dtype=None,
                batch_major=True):
    """x: (B, n_feature); w1: (n_hidden, n_feature); b1: (n_hidden,);
       w2: (n_output, n_hidden); b2: (n_output,). Mirrors torch.nn.Linear.

    Returns (y, h). With batch_major=True (default): y (B, n_output), h (B, n_hidden),
    matching AE2.forward exactly. With batch_major=False the batch-on-lanes kernel
    layout is returned directly: y (n_output, B), h (n_hidden, B) — no extra HBM
    round trip for the transpose.

    Byte-reduction levers (kernel is HBM-bandwidth bound):
      compute_dtype=jnp.bfloat16  -> halves x / weight reads (f32 accumulation kept)
      hidden_dtype=jnp.bfloat16   -> halves the hT writeback (largest stream)
    Both deviate from exact f32 torch semantics; default None keeps f32.
    """
    B, n_feature = x.shape
    n_hidden = w1.shape[0]
    n_output = w2.shape[0]
    orig_dtype = x.dtype
    if output_dtype is None:
        output_dtype = orig_dtype
    if hidden_dtype is None:
        hidden_dtype = orig_dtype

    if compute_dtype is not None:
        x = x.astype(compute_dtype)
        w1 = w1.astype(compute_dtype)
        w2 = w2.astype(compute_dtype)

    # Biases as (out, 1) columns: broadcast against the (out, tile_b) f32 accumulator.
    b1_c = b1.astype(jnp.float32).reshape(n_hidden, 1)
    b2_c = b2.astype(jnp.float32).reshape(n_output, 1)

    # Batch tile: a lane-width multiple, as large as sensible (per-tile VMEM is
    # ~208 B/row f32, so even 32768 rows is only ~14 MiB double-buffered).
    lane = 128
    tile_b = int(tile_b)
    tile_b = max(lane, (min(tile_b, 32768) // lane) * lane)
    # Never bigger than the lane-rounded batch.
    tile_b = min(tile_b, pl.cdiv(B, lane) * lane)
    # Keep >=4 grid steps when the batch allows it (feeds both v7x TensorCores and
    # keeps double-buffering overlap); for large B this cap never binds.
    if B >= 4 * lane:
        tile_b = min(tile_b, max(lane, ((B // 4) // lane) * lane))
    grid = (pl.cdiv(B, tile_b),)

    # Outputs are exactly B wide: no jnp.pad of x, Pallas masks the trailing
    # partial block's stores (padded tail rows compute relu(b1) but are dropped).
    yt, ht = pl.pallas_call(
        ae2_kernel,
        out_shape=(
            jax.ShapeDtypeStruct((n_output, B), output_dtype),
            jax.ShapeDtypeStruct((n_hidden, B), hidden_dtype),
        ),
        grid=grid,
        in_specs=[
            pl.BlockSpec((tile_b, n_feature), lambda i: (i, 0)),     # x tile (streamed)
            pl.BlockSpec((n_hidden, n_feature), lambda i: (0, 0)),   # W1 (resident)
            pl.BlockSpec((n_hidden, 1), lambda i: (0, 0)),           # b1
            pl.BlockSpec((n_output, n_hidden), lambda i: (0, 0)),    # W2 (resident)
            pl.BlockSpec((n_output, 1), lambda i: (0, 0)),           # b2
        ],
        out_specs=(
            pl.BlockSpec((n_output, tile_b), lambda i: (0, i)),      # yT tile
            pl.BlockSpec((n_hidden, tile_b), lambda i: (0, i)),      # hT tile
        ),
        compiler_params=pltpu.CompilerParams(
            dimension_semantics=("parallel",),        # megacore split on v7x
            vmem_limit_bytes=32 * 1024 * 1024,        # plenty for 32k-row tiles, < 64 MiB v7x
        ),
    )(x, w1, b1_c, w2, b2_c)

    if batch_major:
        # Module-exact (B, n) layout; costs one extra HBM round trip of the outputs.
        return yt.T, ht.T
    return yt, ht


if __name__ == "__main__":
    # Shapes consistent with the module: n_feature=16, n_hidden=32, n_output=4.
    B, n_feature, n_hidden, n_output = 1024, 16, 32, 4

    key = jax.random.PRNGKey(0)
    kx, kw1, kb1, kw2, kb2 = jax.random.split(key, 5)

    x = jax.random.normal(kx, (B, n_feature), dtype=jnp.float32)
    # torch.nn.Linear layout: weight (out, in), bias (out,).
    w1 = jax.random.normal(kw1, (n_hidden, n_feature), dtype=jnp.float32) * 0.1
    b1 = jax.random.normal(kb1, (n_hidden,), dtype=jnp.float32) * 0.1
    w2 = jax.random.normal(kw2, (n_output, n_hidden), dtype=jnp.float32) * 0.1
    b2 = jax.random.normal(kb2, (n_output,), dtype=jnp.float32) * 0.1

    # Pure-JAX reference.
    h_ref = jnp.maximum(x @ w1.T + b1, 0.0)
    y_ref = h_ref @ w2.T + b2

    # 1) Default f32 path (module-exact), >=4 grid steps on this batch.
    y, h = ae2_forward(x, w1, b1, w2, b2)
    jax.block_until_ready((y, h))
    assert y.shape == (B, n_output) and h.shape == (B, n_hidden)
    assert jnp.allclose(h, h_ref, atol=1e-4, rtol=1e-4), "hidden mismatch"
    assert jnp.allclose(y, y_ref, atol=1e-4, rtol=1e-4), "output mismatch"

    # 2) Batch-on-lanes output layout (skips the wrapper transpose).
    yt, ht = ae2_forward(x, w1, b1, w2, b2, batch_major=False)
    jax.block_until_ready((yt, ht))
    assert yt.shape == (n_output, B) and ht.shape == (n_hidden, B)
    assert jnp.allclose(ht.T, h_ref, atol=1e-4, rtol=1e-4), "lane-major hidden mismatch"
    assert jnp.allclose(yt.T, y_ref, atol=1e-4, rtol=1e-4), "lane-major output mismatch"

    # 3) Ragged batch (no jnp.pad; trailing partial block masked by Pallas).
    y3, h3 = ae2_forward(x[:300], w1, b1, w2, b2)
    jax.block_until_ready((y3, h3))
    assert jnp.allclose(h3, h_ref[:300], atol=1e-4, rtol=1e-4), "ragged hidden mismatch"
    assert jnp.allclose(y3, y_ref[:300], atol=1e-4, rtol=1e-4), "ragged output mismatch"

    # 4) bf16 bandwidth levers (x/weights + hT storage); f32 accumulation kept.
    y4, h4 = ae2_forward(x, w1, b1, w2, b2,
                         compute_dtype=jnp.bfloat16, hidden_dtype=jnp.bfloat16)
    jax.block_until_ready((y4, h4))
    assert jnp.allclose(h4.astype(jnp.float32), h_ref, atol=5e-2, rtol=5e-2), "bf16 hidden mismatch"
    assert jnp.allclose(y4.astype(jnp.float32), y_ref, atol=5e-2, rtol=5e-2), "bf16 output mismatch"

    print("KERNEL_OK")
</pallas_src>

<mosaic_0001>
module attributes {stable_mosaic.version = 11 : i64} {
  func.func @ae2_kernel(%arg0: i32, %arg1: memref<256x16xf32, #tpu.memory_space<vmem>>, %arg2: memref<32x16xf32, #tpu.memory_space<vmem>>, %arg3: memref<32x1xf32, #tpu.memory_space<vmem>>, %arg4: memref<4x32xf32, #tpu.memory_space<vmem>>, %arg5: memref<4x1xf32, #tpu.memory_space<vmem>>, %arg6: memref<4x256xf32, #tpu.memory_space<vmem>>, %arg7: memref<32x256xf32, #tpu.memory_space<vmem>>) attributes {dimension_semantics = [#tpu.dimension_semantics<parallel>], iteration_bounds = array<i64: 4>, scalar_prefetch = 0 : i64, scratch_operands = 0 : i64, tpu.core_type = #tpu.core_type<tc>, window_params = [{transform_indices = @transform_0, window_bounds = array<i64: 256, 16>}, {pipeline_mode = #tpu.pipeline_mode<synchronous>, transform_indices = @transform_1, window_bounds = array<i64: 32, 16>}, {pipeline_mode = #tpu.pipeline_mode<synchronous>, transform_indices = @transform_2, window_bounds = array<i64: 32, 1>}, {pipeline_mode = #tpu.pipeline_mode<synchronous>, transform_indices = @transform_3, window_bounds = array<i64: 4, 32>}, {pipeline_mode = #tpu.pipeline_mode<synchronous>, transform_indices = @transform_4, window_bounds = array<i64: 4, 1>}, {transform_indices = @transform_5, window_bounds = array<i64: 4, 256>}, {transform_indices = @transform_6, window_bounds = array<i64: 32, 256>}]} {
    %c0 = arith.constant 0 : index
    %c0_0 = arith.constant 0 : index
    %0 = vector.load %arg2[%c0, %c0_0] : memref<32x16xf32, #tpu.memory_space<vmem>>, vector<32x16xf32>
    %c0_1 = arith.constant 0 : index
    %c0_2 = arith.constant 0 : index
    %1 = vector.load %arg1[%c0_1, %c0_2] : memref<256x16xf32, #tpu.memory_space<vmem>>, vector<256x16xf32>
    %cst = arith.constant dense<0.000000e+00> : vector<32x256xf32>
    %2 = tpu.matmul %0, %1, %cst {dimension_numbers = #tpu.dot_dimension_numbers<[1], [1], [0], [0], [0, 0, 1, 0], [], []>} : vector<32x16xf32>, vector<256x16xf32>, vector<32x256xf32> -> vector<32x256xf32>
    %c0_3 = arith.constant 0 : index
    %c0_4 = arith.constant 0 : index
    %3 = vector.load %arg3[%c0_3, %c0_4] : memref<32x1xf32, #tpu.memory_space<vmem>>, vector<32x1xf32>
    %4 = vector.broadcast %3 : vector<32x1xf32> to vector<32x256xf32>
    %5 = arith.addf %2, %4 : vector<32x256xf32>
    %cst_5 = arith.constant 0.000000e+00 : f32
    %6 = vector.broadcast %cst_5 : f32 to vector<32x256xf32>
    %7 = arith.maximumf %5, %6 : vector<32x256xf32>
    %c0_6 = arith.constant 0 : index
    %c0_7 = arith.constant 0 : index
    %8 = vector.load %arg7[%c0_6, %c0_7] : memref<32x256xf32, #tpu.memory_space<vmem>>, vector<32x256xf32>
    tpu.vector_store %arg7[%c0_6, %c0_7], %7 {strides = array<i32>} : memref<32x256xf32, #tpu.memory_space<vmem>>, vector<32x256xf32>,
    %c0_8 = arith.constant 0 : index
    %c0_9 = arith.constant 0 : index
    %9 = vector.load %arg4[%c0_8, %c0_9] : memref<4x32xf32, #tpu.memory_space<vmem>>, vector<4x32xf32>
    %cst_10 = arith.constant dense<0.000000e+00> : vector<4x256xf32>
    %10 = tpu.matmul %9, %7, %cst_10 {dimension_numbers = #tpu.dot_dimension_numbers<[1], [0], [0], [1], [0, 0, 1, 1], [], []>} : vector<4x32xf32>, vector<32x256xf32>, vector<4x256xf32> -> vector<4x256xf32>
    %c0_11 = arith.constant 0 : index
    %c0_12 = arith.constant 0 : index
    %11 = vector.load %arg5[%c0_11, %c0_12] : memref<4x1xf32, #tpu.memory_space<vmem>>, vector<4x1xf32>
    %12 = vector.broadcast %11 : vector<4x1xf32> to vector<4x256xf32>
    %13 = arith.addf %10, %12 : vector<4x256xf32>
    %c0_13 = arith.constant 0 : index
    %c0_14 = arith.constant 0 : index
    %14 = vector.load %arg6[%c0_13, %c0_14] : memref<4x256xf32, #tpu.memory_space<vmem>>, vector<4x256xf32>
    tpu.vector_store %arg6[%c0_13, %c0_14], %13 {strides = array<i32>} : memref<4x256xf32, #tpu.memory_space<vmem>>, vector<4x256xf32>,
    return
  }
  func.func @transform_0(%arg0: i32) -> (i32, i32) {
    %c0_i32 = arith.constant 0 : i32
    %c0_i32_0 = arith.constant 0 : i32
    return %arg0, %c0_i32 : i32, i32
  }
  func.func @transform_1(%arg0: i32) -> (i32, i32) {
    %c0_i32 = arith.constant 0 : i32
    %c0_i32_0 = arith.constant 0 : i32
    %c0_i32_1 = arith.constant 0 : i32
    return %c0_i32, %c0_i32_0 : i32, i32
  }
  func.func @transform_2(%arg0: i32) -> (i32, i32) {
    %c0_i32 = arith.constant 0 : i32
    %c0_i32_0 = arith.constant 0 : i32
    %c0_i32_1 = arith.constant 0 : i32
    return %c0_i32, %c0_i32_0 : i32, i32
  }
  func.func @transform_3(%arg0: i32) -> (i32, i32) {
    %c0_i32 = arith.constant 0 : i32
    %c0_i32_0 = arith.constant 0 : i32
    %c0_i32_1 = arith.constant 0 : i32
    return %c0_i32, %c0_i32_0 : i32, i32
  }
  func.func @transform_4(%arg0: i32) -> (i32, i32) {
    %c0_i32 = arith.constant 0 : i32
    %c0_i32_0 = arith.constant 0 : i32
    %c0_i32_1 = arith.constant 0 : i32
    return %c0_i32, %c0_i32_0 : i32, i32
  }
  func.func @transform_5(%arg0: i32) -> (i32, i32) {
    %c0_i32 = arith.constant 0 : i32
    %c0_i32_0 = arith.constant 0 : i32
    return %c0_i32, %arg0 : i32, i32
  }
  func.func @transform_6(%arg0: i32) -> (i32, i32) {
    %c0_i32 = arith.constant 0 : i32
    %c0_i32_0 = arith.constant 0 : i32
    return %c0_i32, %arg0 : i32, i32
  }
}

</mosaic_0001>

<bundles_post_ra>
// kernel: tpu_custom_call.1
= control target key start
LH: loop header
LB: loop body
LE: loop exit
PB: predicated region body
PF: predicated region fallthrough
CT: control target
= control target key end

     0   :  { %s1162_s0 = inlined_call_operand.vmem [shape: f32[1024,16], index: 0, kind: input, shape index: {}]   ;;  %s1163_s1 = inlined_call_operand.vmem [shape: f32[32,16], index: 1, kind: input, shape index: {}]   ;;  %s1164_s2 = inlined_call_operand.vmem [shape: f32[32,1], index: 2, kind: input, shape index: {}]   ;;  %s1165_s3 = inlined_call_operand.vmem [shape: f32[4,32], index: 3, kind: input, shape index: {}]   ;;  %s1166_s4 = inlined_call_operand.vmem [shape: f32[4,1], index: 4, kind: input, shape index: {}]   ;;  %s1167_s5 = inlined_call_operand.hbm [shape: f32[4,1024], index: 5, kind: output, shape index: {0}]   ;;  %s1168_s6 = inlined_call_operand.hbm [shape: f32[32,1024], index: 6, kind: output, shape index: {1}]  }
   0x1   :  { %1169 = sst [smem:[#allocation8_spill]] %s1162_s0 }
   0x2   :  { %12 = vsyncpa [#allocation3], 0 }
   0x3   :  { %14 = vsyncpa [#allocation3 + $0x1], 0 }
   0x4   :  { %15 = vsyncpa [#allocation5], 0 }
   0x5   :  { %17 = vsyncpa [#allocation5 + $0x1], 0  ;;  %s943_s21 = smov 0   ;;  %s945_s22 = smov 0  }
   0x6   :  { %s947_s23 = smov 0   ;;  %s949_s24 = smov 0  }
   0x7 LB: > { %s964_s25 = sadd.s32 4294967295, %s902_s24   ;;  %s697_s26 = sadd.s32 4294967294, %s902_s24   ;;  %s902_s24 = sphi %s949_s24, %s1176_s24   ;;  %s898_s23 = sphi %s947_s23, %s1175_s23   ;;  %s894_s22 = sphi %s945_s22, %s1174_s22   ;;  %s890_s21 = sphi %s943_s21, %s1173_s21  }
   0x8   : > { %s968_s27 = sadd.s32 1, %s902_s24   ;;  %s140_s28 = sadd.s32 1, %s898_s23 }
   0x9   : > { %s137_s29 = ssub.s32 %s902_s24, %s968_s27  ;;  %p150_p0 = scmp.ne.s32.totalorder %s898_s23, %s894_s22 }
   0xa   : > { %p138_p1 = scmp.eq.s32.totalorder %s137_s29, 0  ;;  %p151_p2 = scmp.eq.s32.totalorder %s964_s25, 3 }
   0xb   : > { %p156_p3 = scmp.ne.s32.totalorder %s894_s22, %s890_s21  ;;  %p157_p4 = scmp.eq.s32.totalorder %s697_s26, 3 }
   0xc   : > { %s979_s30 = scalar_select %p138_p1, %s898_s23, %s140_s28  }
   0xd   : > { %p981_p5 = por %p151_p2, %p150_p0  ;;  %p985_p6 = por %p157_p4, %p156_p3 }
   0xe   : > { %p700_p7 = scmp.ge.s32.totalorder %s902_s24, 1  ;;  %p222_p8 = scmp.lt.s32.totalorder %s902_s24, 5 }
  0x10   : > { %p223_p9 = pnand %p700_p7, %p222_p8 }
  0x11   : > { %s703_s9 = sshll.u32 (!%p223_p9), %s964_s25, 5  ;;  %s1172_s0 = sld [smem:[#allocation8_spill]] (!%p223_p9) }
  0x12   : > { %226 = sbr.rel (%p223_p9) target bundleno = 392 (0x188), region = 40  ;;  %p258_p10 = scmp.lt.s32.totalorder (!%p223_p9), %s703_s9, 127 }
  0x13   : > { %s1094_s15 = sand.u32 (!%p223_p9), 1, %s894_s22   ;;  %s756_s29 = sshll.u32 (!%p223_p9), %s964_s25, 4 }
  0x14   : > { %s702_s16 = sshll.u32 (!%p223_p9), %s1094_s15, 6  ;;  %s598_s11 = scalar_lea.hbm (!%p223_p9), %s1168_s6, %s756_s29 }
  0x15   : > { %s1100_s19 = scalar_lea.vmem (!%p223_p9), [#allocation4], %s702_s16  ;;  %s601_s12 = sshll.u32 (!%p223_p9), %s598_s11, 4  ;;  %s602_s12 = int_to_ptr.hbm [resolvable:$true] %s601_s12 }
  0x16   : > { %s599_s28 = sshll.u32 (!%p223_p9), %s1100_s19, 4  ;;  %s822_s14 = sshra.s32 (!%p223_p9), %s602_s12, 4  ;;  %s600_s28 = int_to_ptr.vmem [resolvable:$true] %s599_s28  ;;  %s823_s14 = int_to_ptr.hbm [resolvable:$true] %s822_s14 }
  0x17   : > { %s1178_s9 = smov (!%p258_p10, %s703_s9), 127  ;;  %vm325_vm0 = vcmask 130048   ;;  %v302_v18 = vld [vmem:[%s1164_s2 + $0x8] sm:$0xff]  ;;  %v904_v21 = vmov 0   ;;  %v301_v24 = vld [vmem:[%s1164_s2] sm:$0xff]  ;;  %v304_v29 = vld [vmem:[%s1164_s2 + $0x18] sm:$0xff]  ;;  %p829_p0 = scmp.lt.s32.totalorder %s823_s14, %s1168_s6 }
  0x18   : > { %s704_s10 = sshll.u32 %s1178_s9, 3  ;;  %806 = vset.pattern.permute.xlu1 %v904_v21  ;;  %805 = vset.pattern.permute.xlu0 %v904_v21  ;;  %v303_v34 = vld [vmem:[%s1164_s2 + $0x10] sm:$0xff]  ;;  %v265_v37 = vld [vmem:[%s1163_s1] sm:$0xff]  ;;  %v266_v38 = vld [vmem:[%s1163_s1 + $0x8] sm:$0xff]  ;;  %vm515_vm1 = vcmask 261120   ;;  %s824_s16 = scalar_lea.hbm %s823_s14, 64 }
  0x19   : > { %s995_s13 = scalar_lea.vmem %s1172_s0, %s704_s10  ;;  %312 = vperm.xlu1 %806, %v302_v18   ;;  %807 = vset.pattern.permute.xlu2 %v904_v21  ;;  %v267_v39 = vld [vmem:[%s1163_s1 + $0x10] sm:$0xff]  ;;  %v268_v40 = vld [vmem:[%s1163_s1 + $0x18] sm:$0xff]  ;;  %v509_v50 = vld [vmem:[%s1166_s4] sm:$0xf]  ;;  %p825_p11 = scmp.ne.s32.totalorder %s823_s14, %s824_s16 }
  0x1a   : > { %v284_v0 = vld [vmem:[%s995_s13 + $0x78] sm:$0xff]  ;;  %v283_v2 = vld [vmem:[%s995_s13 + $0x70] sm:$0xff]  ;;  %v282_v4 = vld [vmem:[%s995_s13 + $0x68] sm:$0xff]  ;;  %322 = vperm.xlu0 %805, %v304_v29   ;;  %512 = vperm.xlu2 %807, %v509_v50  }
  0x1b   : > { %v300_v1 = vld [vmem:[%s995_s13 + $0xf8] sm:$0xff]  ;;  %705 = vmatpush.xpose.msk.msra.mxu0 %vm325_vm0, %v284_v0  ;;  %v299_v3 = vld [vmem:[%s995_s13 + $0xf0] sm:$0xff]  ;;  %v298_v5 = vld [vmem:[%s995_s13 + $0xe8] sm:$0xff]  ;;  %p826_p12 = pnand %p825_p11, %p981_p5 }
  0x1c   : > { %725 = vmatpush.xpose.msk.msra.mxu1 %vm325_vm0, %v300_v1  ;;  %v281_v6 = vld [vmem:[%s995_s13 + $0x60] sm:$0xff]  ;;  %v280_v8 = vld [vmem:[%s995_s13 + $0x58] sm:$0xff]  ;;  %v279_v10 = vld [vmem:[%s995_s13 + $0x50] sm:$0xff] }
  0x1d   : > { %v297_v7 = vld [vmem:[%s995_s13 + $0xe0] sm:$0xff]  ;;  %v296_v9 = vld [vmem:[%s995_s13 + $0xd8] sm:$0xff]  ;;  %v295_v11 = vld [vmem:[%s995_s13 + $0xd0] sm:$0xff]  ;;  %p827_p13 = pneg %p826_p12 }
  0x1e   : > { %v278_v12 = vld [vmem:[%s995_s13 + $0x48] sm:$0xff]  ;;  %v277_v14 = vld [vmem:[%s995_s13 + $0x40] sm:$0xff]  ;;  %v276_v16 = vld [vmem:[%s995_s13 + $0x38] sm:$0xff] }
  0x1f   : > { %706 = vmatpush.xpose.msk.msra.mxu0 %vm325_vm0, %v283_v2  ;;  %v294_v13 = vld [vmem:[%s995_s13 + $0xc8] sm:$0xff]  ;;  %v293_v15 = vld [vmem:[%s995_s13 + $0xc0] sm:$0xff]  ;;  %v292_v17 = vld [vmem:[%s995_s13 + $0xb8] sm:$0xff] }
  0x20   : > { %726 = vmatpush.xpose.msk.msra.mxu1 %vm325_vm0, %v299_v3  ;;  %v275_v19 = vld [vmem:[%s995_s13 + $0x30] sm:$0xff]  ;;  %v274_v22 = vld [vmem:[%s995_s13 + $0x28] sm:$0xff]  ;;  %v273_v25 = vld [vmem:[%s995_s13 + $0x20] sm:$0xff] }
  0x21   : > { %v291_v20 = vld [vmem:[%s995_s13 + $0xb0] sm:$0xff]  ;;  %v290_v23 = vld [vmem:[%s995_s13 + $0xa8] sm:$0xff]  ;;  %v289_v26 = vld [vmem:[%s995_s13 + $0xa0] sm:$0xff]  ;;  %307 = vperm.xlu1 %806, %v301_v24  }
  0x22   : > { %v272_v27 = vld [vmem:[%s995_s13 + $0x18] sm:$0xff]  ;;  %v271_v30 = vld [vmem:[%s995_s13 + $0x10] sm:$0xff]  ;;  %v270_v32 = vld [vmem:[%s995_s13 + $0x8] sm:$0xff]  ;;  %317 = vperm.xlu0 %805, %v303_v34  }
  0x23   : > { %707 = vmatpush.xpose.msk.msra.mxu0 %vm325_vm0, %v282_v4  ;;  %v288_v28 = vld [vmem:[%s995_s13 + $0x98] sm:$0xff]  ;;  %v287_v31 = vld [vmem:[%s995_s13 + $0x90] sm:$0xff]  ;;  %v286_v33 = vld [vmem:[%s995_s13 + $0x88] sm:$0xff] }
  0x24   : > { %727 = vmatpush.xpose.msk.msra.mxu1 %vm325_vm0, %v298_v5  ;;  %v269_v35 = vld [vmem:[%s995_s13] sm:$0xff] }
  0x25   : > { %v285_v36 = vld [vmem:[%s995_s13 + $0x80] sm:$0xff]  ;;  %s572_s13 = scalar_lea.sflag [#allocation5], %s1094_s15 }
  0x27   : > { %708 = vmatpush.xpose.msk.msra.mxu0 %vm325_vm0, %v281_v6  ;;  %v508_v6 = vld [vmem:[%s1165_s3] sm:$0xf] }
  0x28   : > { %728 = vmatpush.xpose.msk.msra.mxu1 %vm325_vm0, %v297_v7 }
  0x2b   : > { %709 = vmatpush.xpose.msk.msra.mxu0 %vm325_vm0, %v280_v8 }
  0x2c   : > { %729 = vmatpush.xpose.msk.msra.mxu1 %vm325_vm0, %v296_v9 }
  0x2f   : > { %710 = vmatpush.xpose.msk.msra.mxu0 %vm325_vm0, %v279_v10 }
  0x30   : > { %730 = vmatpush.xpose.msk.msra.mxu1 %vm325_vm0, %v295_v11 }
  0x33   : > { %711 = vmatpush.xpose.msk.msra.mxu0 %vm325_vm0, %v278_v12 }
  0x34   : > { %731 = vmatpush.xpose.msk.msra.mxu1 %vm325_vm0, %v294_v13 }
  0x37   : > { %712 = vmatpush.xpose.msk.msra.mxu0 %vm325_vm0, %v277_v14 }
  0x38   : > { %732 = vmatpush.xpose.msk.msra.mxu1 %vm325_vm0, %v293_v15 }
  0x3b   : > { %713 = vmatpush.xpose.msk.msra.mxu0 %vm325_vm0, %v276_v16 }
  0x3c   : > { %733 = vmatpush.xpose.msk.msra.mxu1 %vm325_vm0, %v292_v17 }
  0x3f   : > { %714 = vmatpush.xpose.msk.msra.mxu0 %vm325_vm0, %v275_v19 }
  0x40   : > { %734 = vmatpush.xpose.msk.msra.mxu1 %vm325_vm0, %v291_v20 }
  0x43   : > { %715 = vmatpush.xpose.msk.msra.mxu0 %vm325_vm0, %v274_v22 }
  0x44   : > { %735 = vmatpush.xpose.msk.msra.mxu1 %vm325_vm0, %v290_v23 }
  0x47   : > { %716 = vmatpush.xpose.msk.msra.mxu0 %vm325_vm0, %v273_v25 }
  0x48   : > { %736 = vmatpush.xpose.msk.msra.mxu1 %vm325_vm0, %v289_v26 }
  0x4b   : > { %717 = vmatpush.xpose.msk.msra.mxu0 %vm325_vm0, %v272_v27 }
  0x4c   : > { %737 = vmatpush.xpose.msk.msra.mxu1 %vm325_vm0, %v288_v28 }
  0x4f   : > { %718 = vmatpush.xpose.msk.msra.mxu0 %vm325_vm0, %v271_v30 }
  0x50   : > { %738 = vmatpush.xpose.msk.msra.mxu1 %vm325_vm0, %v287_v31 }
  0x53   : > { %719 = vmatpush.xpose.msk.msra.mxu0 %vm325_vm0, %v270_v32 }
  0x54   : > { %739 = vmatpush.xpose.msk.msra.mxu1 %vm325_vm0, %v286_v33 }
  0x57   : > { %720 = vmatpush.xpose.msk.msra.mxu0 %vm325_vm0, %v269_v35 }
  0x58   : > { %740 = vmatpush.xpose.msk.msra.mxu1 %vm325_vm0, %v285_v36 }
  0x5a   : > { %721 = vmatmul.msk.f32.vlgmr.msra.gmra.mxu0 %vm325_vm0, %v265_v37 }
  0x5b   : > { %741 = vmatmul.msk.f32.vlgmr.msra.gmra.mxu1 %vm325_vm0, %v265_v37 }
  0x62   : > { %722 = vmatmul.msk.f32.gmra.mxu0 %vm325_vm0, %v266_v38 }
  0x63   : > { %742 = vmatmul.msk.f32.gmra.mxu1 %vm325_vm0, %v266_v38 }
  0x6a   : > { %723 = vmatmul.msk.f32.gmra.mxu0 %vm325_vm0, %v267_v39 }
  0x6b   : > { %743 = vmatmul.msk.f32.gmra.mxu1 %vm325_vm0, %v267_v39 }
  0x72   : > { %724 = vmatmul.msk.f32.gmra.mxu0 %vm325_vm0, %v268_v40 }
  0x73   : > { %744 = vmatmul.msk.f32.gmra.mxu1 %vm325_vm0, %v268_v40 }
  0x8b   : > { %v313_v41 = vpop.permute.xlu1 %312 }
  0x8c   : > { %v323_v49 = vpop.permute.xlu0 %322 }
  0x93   : > { %v308_v42 = vpop.permute.xlu1 %307 }
  0x94   : > { %v318_v57 = vpop.permute.xlu0 %317 }
  0xd7   : > { %v451_v43 = vpop.f32.mrf.mxu0 }
  0xd8   : > { %v480_v44 = vpop.f32.mrf.mxu1  ;;  %v452_v45 = vadd.f32 %v451_v43, %v308_v42 }
  0xd9   : > { %v481_v46 = vadd.f32 %v480_v44, %v308_v42 }
  0xda   : > { %v492_v47 = vmax.f32 %v452_v45, 0.0 }
  0xdb   : > { %v493_v48 = vmax.f32 %v481_v46, 0.0 }
  0xdc   : > { %500 = vst [vmem:[%s1100_s19] sm:$0xff] %v492_v47 }
  0xdd   : > { %501 = vst [vmem:[%s1100_s19 + $0x8] sm:$0xff] %v493_v48 }
  0xdf   : > { %v454_v51 = vpop.f32.mrf.mxu0 }
  0xe0   : > { %v483_v52 = vpop.f32.mrf.mxu1  ;;  %v455_v53 = vadd.f32 %v454_v51, %v313_v41 }
  0xe1   : > { %v484_v54 = vadd.f32 %v483_v52, %v313_v41 }
  0xe2   : > { %v494_v55 = vmax.f32 %v455_v53, 0.0 }
  0xe3   : > { %v495_v56 = vmax.f32 %v484_v54, 0.0 }
  0xe4   : > { %502 = vst [vmem:[%s1100_s19 + $0x10] sm:$0xff] %v494_v55 }
  0xe5   : > { %503 = vst [vmem:[%s1100_s19 + $0x18] sm:$0xff] %v495_v56 }
  0xe7   : > { %v457_v58 = vpop.f32.mrf.mxu0 }
  0xe8   : > { %v486_v59 = vpop.f32.mrf.mxu1  ;;  %v458_v60 = vadd.f32 %v457_v58, %v318_v57 }
  0xe9   : > { %v487_v61 = vadd.f32 %v486_v59, %v318_v57 }
  0xea   : > { %v496_v62 = vmax.f32 %v458_v60, 0.0 }
  0xeb   : > { %v497_v63 = vmax.f32 %v487_v61, 0.0 }
  0xec   : > { %504 = vst [vmem:[%s1100_s19 + $0x20] sm:$0xff] %v496_v62 }
  0xed   : > { %505 = vst [vmem:[%s1100_s19 + $0x28] sm:$0xff] %v497_v63 }
  0xef   : > { %v460_v0 = vpop.f32.mrf.mxu0 }
  0xf0   : > { %v489_v1 = vpop.f32.mrf.mxu1  ;;  %v461_v2 = vadd.f32 %v460_v0, %v323_v49 }
  0xf1   : > { %v490_v3 = vadd.f32 %v489_v1, %v323_v49 }
  0xf2   : > { %v498_v4 = vmax.f32 %v461_v2, 0.0 }
  0xf3   : > { %v499_v5 = vmax.f32 %v490_v3, 0.0 }
  0xf4   : > { %506 = vst [vmem:[%s1100_s19 + $0x30] sm:$0xff] %v498_v4  ;;  %531 = vmatpush.msra.mxu2 %v498_v4 }
  0xf5   : > { %551 = vmatpush.msra.mxu3 %v499_v5  ;;  %507 = vst [vmem:[%s1100_s19 + $0x38] sm:$0xff] %v499_v5  ;;  %s828_s19 = scalar_lea.hbm %s1168_s6, 256 }
  0xf6   : > { %532 = vmatpush.msra.mxu2 %v496_v62  ;;  %p830_p1 = scmp.lt.s32.totalorder %s828_s19, %s824_s16 }
  0xf7   : > { %552 = vmatpush.msra.mxu3 %v497_v63 }
  0xf8   : > { %533 = vmatpush.msra.mxu2 %v494_v55  ;;  %p831_p2 = por %p830_p1, %p829_p0 }
  0xf9   : > { %553 = vmatpush.msra.mxu3 %v495_v56 }
  0xfa   : > { %534 = vmatpush.msra.mxu2 %v492_v47  ;;  %p832_p3 = pnand %p831_p2, %p827_p13 }
  0xfb   : > { %554 = vmatpush.msra.mxu3 %v493_v48  ;;  %745 = vmatmul.msk.f32.vlgmr.msra.gmra.mxu2 %vm515_vm1, %v508_v6 }
  0xfc   : > { %746 = vmatmul.msk.f32.vlgmr.msra.gmra.mxu3 %vm515_vm1, %v508_v6 }
  0xfd   : > { %835 = shalt.err (!%p832_p3)
}
  0xfe   : > { %s905_s29 = smov 256   ;;  %s906_s9 = smov 1024   ;;  %v513_v7 = vpop.permute.xlu2 %512  ;;  %vm562_vm2 = vcmask 1043456  }
  0xff   : > { %s907_s10 = smov 16   ;;  %s701_s11 = sshll.u32 %s1094_s15, 3 }
 0x100   : > { %758 = dma.vmem_to_hbm [thread:$0]  (%p981_p5), %s600_s28, 1024, %s602_s12, %s572_s13, %s905_s29, %s906_s9, %s907_s10  }
 0x101   : > { %s755_s0 = sshll.u32 %s964_s25, 3  ;;  %s249_s16 = scalar_lea.vmem [#allocation2], %s701_s11 }
 0x102   : > { %s583_s14 = scalar_lea.hbm %s1167_s5, %s755_s0  ;;  %s585_s19 = sshll.u32 %s249_s16, 4  ;;  %s586_s19 = int_to_ptr.vmem [resolvable:$true] %s585_s19 }
 0x103   : > { %s587_s20 = sshll.u32 %s583_s14, 4  ;;  %s567_s25 = scalar_lea.sflag [#allocation3], %s1094_s15  ;;  %s588_s20 = int_to_ptr.hbm [resolvable:$true] %s587_s20 }
 0x104   : > { %s850_s28 = sshra.s32 %s588_s20, 4  ;;  %s856_s26 = scalar_lea.hbm %s1167_s5, 32  ;;  %s851_s28 = int_to_ptr.hbm [resolvable:$true] %s850_s28 }
 0x105   : > { %s852_s12 = scalar_lea.hbm %s851_s28, 8  ;;  %p857_p9 = scmp.lt.s32.totalorder %s851_s28, %s1167_s5 }
 0x106   : > { %p853_p4 = scmp.ne.s32.totalorder %s851_s28, %s852_s12  ;;  %p858_p10 = scmp.lt.s32.totalorder %s856_s26, %s852_s12 }
 0x108   : > { %p854_p7 = pnand %p853_p4, %p981_p5  ;;  %p859_p11 = por %p858_p10, %p857_p9 }
 0x10a   : > { %p855_p8 = pneg %p854_p7 }
 0x10c   : > { %p860_p12 = pnand %p859_p11, %p855_p8 }
 0x17e   : > { %v536_v8 = vpop.f32.mrf.mxu2 }
 0x17f   : > { %v556_v9 = vpop.f32.mrf.mxu3  ;;  %v537_v11 = vadd.f32 %v536_v8, %v513_v7 }
 0x180   : > { %v557_v10 = vadd.f32 %v556_v9, %v513_v7 }
 0x182   : > { %v561_v12 = vrot.slane %v557_v10, 4 }
 0x184   : > { %v563_v13 = vsel %vm562_vm2, %v537_v11, %v561_v12 }
 0x185   : > { %565 = vst [vmem:[%s249_s16] sm:$0xff] %v563_v13 }
 0x186   : > { %863 = shalt.err (!%p860_p12)
}
 0x187   : > { %757 = dma.vmem_to_hbm [thread:$0]  (%p981_p5), %s586_s19, 128, %s588_s20, %s567_s25  }
 0x188 PF: > { %p768_p13 = scmp.ge.s32.totalorder %s902_s24, 2  ;;  %s616_s15 = sand.u32 1, %s890_s21  }
 0x189   : > { %s617_s10 = scalar_lea.sflag [#allocation3], %s616_s15 }
 0x18a   : > { %p762_p0 = pnand %p768_p13, %p985_p6 }
 0x18c   : > { %p763_p1 = pneg %p762_p0 }
 0x18e   : > { %881 = dma.done.wait (%p763_p1), %s617_s10, 128  }
 0x18f   : > { %883 = vsyncadd (%p763_p1), %s617_s10, 4294967168  ;;  %s627_s11 = scalar_lea.sflag [#allocation5], %s616_s15 }
 0x190   : > { %885 = dma.done.wait (%p763_p1), %s627_s11, 1024  }
 0x191   : > { %887 = vsyncadd (%p763_p1), %s627_s11, 4294966272  ;;  %p20_p5 = scmp.ge.s32.totalorder %s968_s27, 6   ;;  %s1173_s21 = smov %s894_s22 }
 0x192   : > { %s1174_s22 = smov %s898_s23  ;;  %s1175_s23 = smov %s979_s30 }
 0x193   : > { %s1176_s24 = smov %s968_s27  ;;  %22 = sbr.rel (!%p20_p5) target bundleno = 7 (0x7), region = 92 }
 0x198   :  { %633 = vsyncpa [#allocation3], 1 }
 0x199   :  { %635 = vsyncpa [#allocation3 + $0x1], 1 }
 0x19a   :  { %636 = vsyncpa [#allocation5], 1 }
 0x19b   :  { %638 = vsyncpa [#allocation5 + $0x1], 1 }

</bundles_post_ra>
